<compile_context>
chip_gen: v5e
topology: v5e:2x2
jax: 0.10.0
libtpu: 0.0.40
codegen_flags: <defaults>
</compile_context>

<pallas_src>
import jax
import jax.numpy as jnp
import numpy as np
from jax.experimental import pallas as pl
from jax.experimental.pallas import tpu as pltpu


def _cdiv(a, b):
    return -(-a // b)


def _round_up(a, b):
    return _cdiv(a, b) * b


def _sublane_unit(dtype):
    # f32 -> 8, bf16/f16 -> 16, int8/fp8 -> 32 sublane tiling.
    return {4: 8, 2: 16, 1: 32}.get(jnp.dtype(dtype).itemsize, 8)


def _choose_tile(size, target, unit):
    """Pick a tile: multiple of `unit`, near `target`, minimal padding waste."""
    rounded = _round_up(size, unit)
    if rounded <= target:
        return rounded
    n_tiles = _cdiv(rounded, target)
    return _round_up(_cdiv(rounded, n_tiles), unit)


def l1_loss_weight_delete(inp, out, weights, denorm,
                          tile_r_target=64, tile_hw_target=8192):
    """mean(|inp*denorm*weights - out*denorm*weights|); denorm broadcast over channels.

    inp, out, weights: (B, C, H, W) float.  denorm: (C,) float.
    """
    B, C, H, W = inp.shape
    HW = H * W
    R = B * C
    n_elems = R * HW

    row_unit = max(_sublane_unit(inp.dtype), _sublane_unit(out.dtype),
                   _sublane_unit(weights.dtype))

    TILE_R = _choose_tile(R, tile_r_target, row_unit)
    TILE_HW = _choose_tile(HW, tile_hw_target, 128)
    n_r = _cdiv(R, TILE_R)
    # v7x megacore: prefer >= 2 independent row tiles so both TensorCores stream.
    if n_r == 1 and TILE_R >= 2 * row_unit:
        TILE_R = _round_up(_cdiv(TILE_R, 2), row_unit)
        n_r = _cdiv(R, TILE_R)
    n_hw = _cdiv(HW, TILE_HW)

    n_groups = TILE_HW // 128
    needs_row_mask = (n_r * TILE_R != R)
    needs_col_mask = (n_hw * TILE_HW != HW)

    # NCHW -> (B*C, H*W), native dtype (no wrapper upcast / no big-array padding).
    inp2 = inp.reshape(R, HW)
    out2 = out.reshape(R, HW)
    w2 = weights.reshape(R, HW)

    # Per-row |denorm[channel]| scale (row index = b*C + c). Tiny array: pad it so the
    # last row tile never sees garbage (padded rows multiply zero accumulator rows).
    scale = jnp.tile(jnp.abs(denorm.astype(jnp.float32)), B).reshape(R, 1)
    if n_r * TILE_R != R:
        scale = jnp.pad(scale, ((0, n_r * TILE_R - R), (0, 0)))

    def kernel(scale_ref, inp_ref, out_ref, w_ref, partial_ref, acc_ref):
        hw_i = pl.program_id(1)

        # First spatial tile of this row tile: zero the (TILE_R, 128) accumulator.
        @pl.when(hw_i == 0)
        def _():
            acc_ref[...] = jnp.zeros_like(acc_ref)

        if needs_row_mask:
            row_ids = (pl.program_id(0) * TILE_R
                       + jax.lax.broadcasted_iota(jnp.int32, (TILE_R, 128), 0))
            row_ok = row_ids < R
        if needs_col_mask:
            lane_iota = jax.lax.broadcasted_iota(jnp.int32, (TILE_R, 128), 1)
            hw_base = hw_i * TILE_HW

        # Fold the block's lane groups with VALU adds into a (TILE_R, 128) local,
        # touching acc_ref only once per grid step.
        local = jnp.zeros((TILE_R, 128), jnp.float32)
        for g in range(n_groups):
            sl = pl.ds(g * 128, 128)
            d = (inp_ref[:, sl].astype(jnp.float32)
                 - out_ref[:, sl].astype(jnp.float32))
            t = jnp.abs(d * w_ref[:, sl].astype(jnp.float32))
            mask = None
            if needs_col_mask:
                mask = (hw_base + g * 128 + lane_iota) < HW
            if needs_row_mask:
                mask = row_ok if mask is None else (mask & row_ok)
            if mask is not None:
                t = jnp.where(mask, t, 0.0)
            local = local + t
        acc_ref[...] += local

        # Last spatial tile: apply the per-row |denorm| scale once, one XLU reduce.
        @pl.when(hw_i == pl.num_programs(1) - 1)
        def _():
            partial_ref[0, 0] = jnp.sum(acc_ref[...] * scale_ref[...])

    grid_spec = pltpu.PrefetchScalarGridSpec(
        num_scalar_prefetch=0,
        grid=(n_r, n_hw),
        in_specs=[
            pl.BlockSpec((TILE_R, 1), lambda r, h: (r, 0)),        # per-row |denorm|
            pl.BlockSpec((TILE_R, TILE_HW), lambda r, h: (r, h)),  # inp
            pl.BlockSpec((TILE_R, TILE_HW), lambda r, h: (r, h)),  # out
            pl.BlockSpec((TILE_R, TILE_HW), lambda r, h: (r, h)),  # weights
        ],
        out_specs=pl.BlockSpec((1, 1), lambda r, h: (r, 0),
                               memory_space=pltpu.SMEM),           # per-row-tile partial
        scratch_shapes=[pltpu.VMEM((TILE_R, 128), jnp.float32)],
    )

    bytes_accessed = (inp2.size * inp2.dtype.itemsize
                      + out2.size * out2.dtype.itemsize
                      + w2.size * w2.dtype.itemsize
                      + scale.size * 4 + n_r * 4)
    cost = pl.CostEstimate(flops=5 * n_elems, transcendentals=0,
                           bytes_accessed=bytes_accessed)

    partials = pl.pallas_call(
        kernel,
        out_shape=jax.ShapeDtypeStruct((n_r, 1), jnp.float32),
        grid_spec=grid_spec,
        compiler_params=pltpu.CompilerParams(
            # Row tiles are independent (own output slot) -> megacore-safe "parallel";
            # spatial axis accumulates into the VMEM scratch -> "arbitrary".
            dimension_semantics=("parallel", "arbitrary"),
            vmem_limit_bytes=28 * 1024 * 1024,
        ),
        cost_estimate=cost,
    )(scale, inp2, out2, w2)

    return jnp.sum(partials) / jnp.float32(n_elems)


if __name__ == "__main__":
    def reference(inp, out, weights, denorm):
        C = denorm.shape[0]
        d4 = denorm.reshape(1, C, 1, 1).astype(jnp.float32)
        i = inp.astype(jnp.float32)
        o = out.astype(jnp.float32)
        w = weights.astype(jnp.float32)
        return jnp.mean(jnp.abs(i * d4 * w - o * d4 * w))

    # Case 1: module-typical small shape (aligned), deterministic params.
    B, C, H, W = 2, 4, 16, 16
    m_np = np.arange(C, dtype=np.float32) * 0.5
    M_np = m_np + 1.0 + 0.1 * np.arange(C, dtype=np.float32)
    denorm = jnp.asarray(2.0 * (M_np - m_np), dtype=jnp.float32)   # (C,)

    k1, k2, k3 = jax.random.split(jax.random.PRNGKey(0), 3)
    inp = jax.random.normal(k1, (B, C, H, W), dtype=jnp.float32)
    out = jax.random.normal(k2, (B, C, H, W), dtype=jnp.float32)
    weights = (jax.random.uniform(k3, (B, C, H, W)) > 0.3).astype(jnp.float32)

    loss = jax.block_until_ready(l1_loss_weight_delete(inp, out, weights, denorm))
    ref = reference(inp, out, weights, denorm)
    assert np.allclose(np.asarray(loss), np.asarray(ref), rtol=1e-5, atol=1e-6), (
        float(loss), float(ref))

    # Case 2: unaligned shape exercising in-kernel row + lane edge masking and a
    # multi-tile grid (no wrapper-side padding of the big operands anymore).
    B2, C2, H2, W2 = 3, 3, 20, 21
    denorm2 = jnp.asarray(2.0 * (np.arange(C2, dtype=np.float32) * 0.3 + 0.7),
                          dtype=jnp.float32)
    k4, k5, k6 = jax.random.split(jax.random.PRNGKey(1), 3)
    inp_b = jax.random.normal(k4, (B2, C2, H2, W2), dtype=jnp.float32)
    out_b = jax.random.normal(k5, (B2, C2, H2, W2), dtype=jnp.float32)
    w_b = (jax.random.uniform(k6, (B2, C2, H2, W2)) > 0.5).astype(jnp.float32)

    loss2 = jax.block_until_ready(
        l1_loss_weight_delete(inp_b, out_b, w_b, denorm2, tile_hw_target=256))
    ref2 = reference(inp_b, out_b, w_b, denorm2)
    assert np.allclose(np.asarray(loss2), np.asarray(ref2), rtol=1e-5, atol=1e-6), (
        float(loss2), float(ref2))

    # Case 3: bf16 activations streamed natively (upcast happens in-kernel),
    # f32 0/1 weights mask; aligned shape.
    B3, C3, H3, W3 = 2, 8, 16, 16
    denorm3 = jnp.asarray(2.0 * (np.arange(C3, dtype=np.float32) * 0.2 + 0.5),
                          dtype=jnp.float32)
    k7, k8, k9 = jax.random.split(jax.random.PRNGKey(2), 3)
    inp_c = jax.random.normal(k7, (B3, C3, H3, W3), dtype=jnp.float32).astype(jnp.bfloat16)
    out_c = jax.random.normal(k8, (B3, C3, H3, W3), dtype=jnp.float32).astype(jnp.bfloat16)
    w_c = (jax.random.uniform(k9, (B3, C3, H3, W3)) > 0.4).astype(jnp.float32)

    loss3 = jax.block_until_ready(l1_loss_weight_delete(inp_c, out_c, w_c, denorm3))
    ref3 = reference(inp_c, out_c, w_c, denorm3)
    assert np.allclose(np.asarray(loss3), np.asarray(ref3), rtol=1e-4, atol=1e-5), (
        float(loss3), float(ref3))

    print("KERNEL_OK")
</pallas_src>

<mosaic_0001>
module attributes {stable_mosaic.version = 11 : i64} {
  func.func @kernel(%arg0: i32, %arg1: i32, %arg2: memref<8x1xf32, #tpu.memory_space<vmem>>, %arg3: memref<8x256xf32, #tpu.memory_space<vmem>>, %arg4: memref<8x256xf32, #tpu.memory_space<vmem>>, %arg5: memref<8x256xf32, #tpu.memory_space<vmem>>, %arg6: memref<1x1xf32, #tpu.memory_space<smem>>, %arg7: memref<8x128xf32, #tpu.memory_space<vmem>>) attributes {dimension_semantics = [#tpu.dimension_semantics<parallel>, #tpu.dimension_semantics<arbitrary>], iteration_bounds = array<i64: 1, 1>, scalar_prefetch = 0 : i64, scratch_operands = 1 : i64, tpu.core_type = #tpu.core_type<tc>, window_params = [{transform_indices = @transform_0, window_bounds = array<i64: 8, 1>}, {transform_indices = @transform_1, window_bounds = array<i64: 8, 256>}, {transform_indices = @transform_2, window_bounds = array<i64: 8, 256>}, {transform_indices = @transform_3, window_bounds = array<i64: 8, 256>}, {transform_indices = @transform_4, window_bounds = array<i64: 1, 1>}]} {
    %c0_i32 = arith.constant 0 : i32
    %0 = arith.cmpi eq, %arg1, %c0_i32 : i32
    %1 = arith.extui %0 : i1 to i32
    %c0_i32_0 = arith.constant 0 : i32
    %2 = arith.cmpi ne, %1, %c0_i32_0 : i32
    scf.if %2 {
      %cst_17 = arith.constant 0.000000e+00 : f32
      %24 = vector.broadcast %cst_17 : f32 to vector<8x128xf32>
      %c0_18 = arith.constant 0 : index
      %c0_19 = arith.constant 0 : index
      %25 = vector.load %arg7[%c0_18, %c0_19] : memref<8x128xf32, #tpu.memory_space<vmem>>, vector<8x128xf32>
      tpu.vector_store %arg7[%c0_18, %c0_19], %24 {strides = array<i32>} : memref<8x128xf32, #tpu.memory_space<vmem>>, vector<8x128xf32>,
    } else {
    }
    %cst = arith.constant 0.000000e+00 : f32
    %3 = vector.broadcast %cst : f32 to vector<8x128xf32>
    %c0 = arith.constant 0 : index
    %c0_1 = arith.constant 0 : index
    %4 = vector.load %arg3[%c0, %c0_1] : memref<8x256xf32, #tpu.memory_space<vmem>>, vector<8x128xf32>
    %c0_2 = arith.constant 0 : index
    %c0_3 = arith.constant 0 : index
    %5 = vector.load %arg4[%c0_2, %c0_3] : memref<8x256xf32, #tpu.memory_space<vmem>>, vector<8x128xf32>
    %6 = arith.subf %4, %5 : vector<8x128xf32>
    %c0_4 = arith.constant 0 : index
    %c0_5 = arith.constant 0 : index
    %7 = vector.load %arg5[%c0_4, %c0_5] : memref<8x256xf32, #tpu.memory_space<vmem>>, vector<8x128xf32>
    %8 = arith.mulf %6, %7 : vector<8x128xf32>
    %9 = math.absf %8 : vector<8x128xf32>
    %10 = arith.addf %3, %9 : vector<8x128xf32>
    %c0_6 = arith.constant 0 : index
    %c128 = arith.constant 128 : index
    %11 = vector.load %arg3[%c0_6, %c128] : memref<8x256xf32, #tpu.memory_space<vmem>>, vector<8x128xf32>
    %c0_7 = arith.constant 0 : index
    %c128_8 = arith.constant 128 : index
    %12 = vector.load %arg4[%c0_7, %c128_8] : memref<8x256xf32, #tpu.memory_space<vmem>>, vector<8x128xf32>
    %13 = arith.subf %11, %12 : vector<8x128xf32>
    %c0_9 = arith.constant 0 : index
    %c128_10 = arith.constant 128 : index
    %14 = vector.load %arg5[%c0_9, %c128_10] : memref<8x256xf32, #tpu.memory_space<vmem>>, vector<8x128xf32>
    %15 = arith.mulf %13, %14 : vector<8x128xf32>
    %16 = math.absf %15 : vector<8x128xf32>
    %17 = arith.addf %10, %16 : vector<8x128xf32>
    %c0_11 = arith.constant 0 : index
    %c0_12 = arith.constant 0 : index
    %18 = vector.load %arg7[%c0_11, %c0_12] : memref<8x128xf32, #tpu.memory_space<vmem>>, vector<8x128xf32>
    %19 = arith.addf %18, %17 : vector<8x128xf32>
    %c0_13 = arith.constant 0 : index
    %c0_14 = arith.constant 0 : index
    %20 = vector.load %arg7[%c0_13, %c0_14] : memref<8x128xf32, #tpu.memory_space<vmem>>, vector<8x128xf32>
    tpu.vector_store %arg7[%c0_13, %c0_14], %19 {strides = array<i32>} : memref<8x128xf32, #tpu.memory_space<vmem>>, vector<8x128xf32>,
    %c0_i32_15 = arith.constant 0 : i32
    %21 = arith.cmpi eq, %arg1, %c0_i32_15 : i32
    %22 = arith.extui %21 : i1 to i32
    %c0_i32_16 = arith.constant 0 : i32
    %23 = arith.cmpi ne, %22, %c0_i32_16 : i32
    scf.if %23 {
      %c0_17 = arith.constant 0 : index
      %c0_18 = arith.constant 0 : index
      %24 = vector.load %arg7[%c0_17, %c0_18] : memref<8x128xf32, #tpu.memory_space<vmem>>, vector<8x128xf32>
      %c0_19 = arith.constant 0 : index
      %c0_20 = arith.constant 0 : index
      %25 = vector.load %arg2[%c0_19, %c0_20] : memref<8x1xf32, #tpu.memory_space<vmem>>, vector<8x1xf32>
      %26 = vector.broadcast %25 : vector<8x1xf32> to vector<8x128xf32>
      %27 = arith.mulf %24, %26 : vector<8x128xf32>
      %28 = vector.shape_cast %27 : vector<8x128xf32> to vector<1x8x128xf32>
      %cst_21 = arith.constant dense<0.000000e+00> : vector<1xf32>
      %29 = vector.multi_reduction <add>, %28, %cst_21 [1, 2] : vector<1x8x128xf32> to vector<1xf32>
      %30 = vector.shape_cast %29 : vector<1xf32> to vector<1x1x1xf32>
      %31 = vector.extract %30[0, 0, 0] : f32 from vector<1x1x1xf32>
      %c0_22 = arith.constant 0 : index
      %c0_23 = arith.constant 0 : index
      %32 = memref.load %arg6[%c0_22, %c0_23] : memref<1x1xf32, #tpu.memory_space<smem>>
      memref.store %31, %arg6[%c0_22, %c0_23] : memref<1x1xf32, #tpu.memory_space<smem>>
    } else {
    }
    return
  }
  func.func @transform_0(%arg0: i32, %arg1: i32) -> (i32, i32) {
    %c0_i32 = arith.constant 0 : i32
    %c0_i32_0 = arith.constant 0 : i32
    return %arg0, %c0_i32 : i32, i32
  }
  func.func @transform_1(%arg0: i32, %arg1: i32) -> (i32, i32) {
    %c0_i32 = arith.constant 0 : i32
    return %arg0, %arg1 : i32, i32
  }
  func.func @transform_2(%arg0: i32, %arg1: i32) -> (i32, i32) {
    %c0_i32 = arith.constant 0 : i32
    return %arg0, %arg1 : i32, i32
  }
  func.func @transform_3(%arg0: i32, %arg1: i32) -> (i32, i32) {
    %c0_i32 = arith.constant 0 : i32
    return %arg0, %arg1 : i32, i32
  }
  func.func @transform_4(%arg0: i32, %arg1: i32) -> (i32, i32) {
    %c0_i32 = arith.constant 0 : i32
    %c0_i32_0 = arith.constant 0 : i32
    return %arg0, %c0_i32 : i32, i32
  }
}

</mosaic_0001>

<bundles_post_ra>
// kernel: tpu_custom_call.1
= control target key start
LH: loop header
LB: loop body
LE: loop exit
PB: predicated region body
PF: predicated region fallthrough
CT: control target
= control target key end

     0   :  { %9 = vsyncpa [#allocation4], 0  ;;  %s263_s0 = inlined_call_operand.vmem [shape: f32[8,1], index: 0, kind: input, shape index: {}]   ;;  %s264_s1 = inlined_call_operand.hbm [shape: f32[8,256], index: 1, kind: input, shape index: {}]   ;;  %s265_s2 = inlined_call_operand.hbm [shape: f32[8,256], index: 2, kind: input, shape index: {}]   ;;  %s266_s3 = inlined_call_operand.hbm [shape: f32[8,256], index: 3, kind: input, shape index: {}]   ;;  %s267_s4 = inlined_call_operand.hbm [shape: f32[1,1], index: 4, kind: output, shape index: {}]  }
   0x1   :  { %10 = vsyncpa [#allocation7], 0  ;;  %s30_s17 = sshll.u32 %s265_s2, 4  ;;  %s31_s17 = int_to_ptr.hbm [resolvable:$true] %s30_s17 }
   0x2   :  { %11 = vsyncpa [#allocation5], 0  ;;  %s218_s18 = smov [#allocation6]   ;;  %s19_s22 = sshll.u32 %s264_s1, 4  ;;  %s20_s22 = int_to_ptr.hbm [resolvable:$true] %s19_s22 }
   0x3   :  { %s32_s19 = sshll.u32 %s218_s18, 4  ;;  %s219_s23 = smov [#allocation3]   ;;  %s33_s19 = int_to_ptr.vmem [resolvable:$true] %s32_s19 }
   0x4   :  { %35 = dma.hbm_to_vmem [thread:$0]  %s31_s17, 256, %s33_s19, [#allocation7]  }
   0x5   :  { %s21_s24 = sshll.u32 %s219_s23, 4  ;;  %s41_s27 = sshll.u32 %s266_s3, 4  ;;  %s22_s24 = int_to_ptr.vmem [resolvable:$true] %s21_s24  ;;  %s42_s27 = int_to_ptr.hbm [resolvable:$true] %s41_s27 }
   0x6   :  { %24 = dma.hbm_to_vmem [thread:$0]  %s20_s22, 256, %s22_s24, [#allocation4]  }
   0x7   :  { %s220_s2 = smov [#allocation8]  }
   0x8   :  { %s43_s28 = sshll.u32 %s220_s2, 4  ;;  %s44_s28 = int_to_ptr.vmem [resolvable:$true] %s43_s28 }
   0x9   :  { %46 = dma.hbm_to_vmem [thread:$0]  %s42_s27, 256, %s44_s28, [#allocation7]  }
   0xa   :  { %212 = dma.done.wait [#allocation4], 256  }
   0xb   :  { %213 = vsyncadd [#allocation4], 4294967040 }
   0xc   :  { %214 = dma.done.wait [#allocation7], 512  }
   0xd   :  { %215 = vsyncadd [#allocation7], 4294966784  ;;  %v221_v0 = vmov 0   ;;  %v85_v1 = vld [vmem:[%s263_s0] sm:$0xff]  ;;  %v65_v3 = vld [vmem:[#allocation6] sm:$0xff]  ;;  %s108_s30 = sshll.u32 %s267_s4, 4  ;;  %s109_s30 = int_to_ptr.hbm [resolvable:$true] %s108_s30 }
   0xe   :  { %127 = vset.pattern.permute.xlu0 %v221_v0  ;;  %v64_v2 = vld [vmem:[#allocation3] sm:$0xff]  ;;  %v71_v4 = vld [vmem:[#allocation3 + $0x8] sm:$0xff]  ;;  %v72_v5 = vld [vmem:[#allocation6 + $0x8] sm:$0xff]  ;;  %s222_s6 = smov [#allocation9]  }
   0xf   :  { %88 = vperm.xlu0 %127, %v85_v1   ;;  %v66_v6 = vsub.f32 %v64_v2, %v65_v3  ;;  %v73_v7 = vsub.f32 %v71_v4, %v72_v5  ;;  %v67_v8 = vld [vmem:[#allocation8] sm:$0xff]  ;;  %v74_v9 = vld [vmem:[#allocation8 + $0x8] sm:$0xff] }
  0x11   :  { %v68_v10 = vmul.f32 %v67_v8, %v66_v6  ;;  %v75_v11 = vmul.f32 %v74_v9, %v73_v7 }
  0x13   :  { %v69_v12 = vand.u32 2147483647, %v68_v10  ;;  %v76_v13 = vand.u32 2147483647, %v75_v11 }
  0x15   :  { %v77_v14 = vadd.f32 %v76_v13, %v69_v12 }
  0x81   :  { %v89_v15 = vpop.permute.xlu0 %88 }
  0x82   :  { %v91_v16 = vmul.f32 %v89_v15, %v77_v14 }
  0x84   :  { %92 = vadd.xlane.f32.xlu0 %v91_v16 }
  0xf7   :  { %v93_v17 = vpop.xlane.xlu0 %92 }
  0xf8   :  { %v94_v18 = vrot.slane %v93_v17, 4 }
  0xfa   :  { %v95_v19 = vadd.f32 %v94_v18, %v93_v17 }
  0xfc   :  { %v96_v20 = vrot.slane %v95_v19, 2 }
  0xfe   :  { %v97_v21 = vadd.f32 %v96_v20, %v95_v19 }
 0x100   :  { %v98_v22 = vrot.slane %v97_v21, 1 }
 0x102   :  { %v99_v23 = vadd.f32 %v98_v22, %v97_v21 }
 0x104   :  { %120 = vpush %v99_v23 }
 0x135   :  { %s121_s5 = spop %120 }
 0x136   :  { %102 = sst [smem:[#allocation9]] %s121_s5 }
 0x137   :  { %111 = dma.smem_to_hbm %s222_s6, 16, %s109_s30, [#allocation5]  }
 0x138   :  { %216 = dma.done.wait [#allocation5], 16  }
 0x139   :  { %217 = vsyncadd [#allocation5], 4294967280 }
 0x13a   :  { %116 = sfence }
 0x13b   :  { %117 = vsyncpa [#allocation4], 1 }
 0x13c   :  { %118 = vsyncpa [#allocation7], 1 }
 0x13d   :  { %119 = vsyncpa [#allocation5], 1 }

</bundles_post_ra>
